<compile_context>
chip_gen: v6e
topology: v6e:2x2x1
jax: 0.10.0
libtpu: 0.0.40
codegen_flags: <defaults>
</compile_context>

<pallas_src>
import functools

import jax
import jax.numpy as jnp
from jax.experimental import pallas as pl
from jax.experimental.pallas import tpu as pltpu


def _round_up(x: int, m: int) -> int:
    return ((x + m - 1) // m) * m


def _vmem_capacity_bytes() -> int:
    """Hardware VMEM capacity (64 MiB v7x, 128 MiB v5e/v6e); conservative fallback."""
    try:
        info = pltpu.get_tpu_info()
        cap = getattr(info, "vmem_capacity_bytes", None)
        if cap:
            return int(cap)
    except Exception:
        pass
    return 64 << 20


def _pad_dims(in_features: int, out_features: int, rank: int):
    """Padded dims: lane-dense output, ONE 128-pad across all rank+1 packed column
    groups, and K padding compatible with the K tiling chosen in the wrapper."""
    o_pad = _round_up(out_features, 128)
    n_pad = _round_up((rank + 1) * out_features, 128)
    f_pad = (_round_up(in_features, 128) if in_features <= 2048
             else _round_up(in_features, 1024))
    return o_pad, n_pad, f_pad


def _quad_poly_kernel(x_ref, w_ref, sq_ref, sl_ref, out_ref, acc_ref, *,
                      sqrt: bool, eps: float):
    """Grid = (b, k): b = batch tile ("parallel"), k = in_features reduction tile."""
    k = pl.program_id(1)

    @pl.when(k == 0)
    def _():
        acc_ref[...] = jnp.zeros_like(acc_ref)

    # One wide MXU matmul per grid step: (t_b, t_k) @ (t_k, n_pad), f32 accumulation.
    acc_ref[...] += jnp.dot(x_ref[...], w_ref[...],
                            preferred_element_type=jnp.float32)

    # K reduction complete: square-and-sum the packed quadratic groups and add
    # the linear group via two small selection matmuls, then write the output.
    @pl.when(k == pl.num_programs(1) - 1)
    def _():
        p = acc_ref[...]                                          # (t_b, n_pad) f32
        quad = jnp.dot(p * p, sq_ref[...], preferred_element_type=jnp.float32)
        lin = jnp.dot(p, sl_ref[...], preferred_element_type=jnp.float32)
        if sqrt:
            quad = jnp.sqrt(quad + eps)
        out_ref[...] = (quad + lin).astype(out_ref.dtype)


def prepare_quadratic_weights(w_linear, w_quadratic, *, rank: int,
                              out_features: int, in_features: int,
                              n_pad: int, f_pad: int, o_pad: int,
                              compute_dtype=jnp.bfloat16):
    """One-time (parameter-load-time) prep.  Returns:
       w_cat  : (f_pad, n_pad)  packed [quad groups | linear] transposed weight
       s_quad : (n_pad, o_pad)  f32 selection matrix: quad column r*O+o -> output o
       s_lin  : (n_pad, o_pad)  f32 selection matrix: linear column o     -> output o
    Padded rows/cols are zero, so padding is exact for both branches."""
    O, F = out_features, in_features
    w_cat = jnp.zeros((f_pad, n_pad), compute_dtype)
    w_cat = w_cat.at[:F, :rank * O].set(
        jnp.transpose(w_quadratic).astype(compute_dtype))        # col r*O+o
    w_cat = w_cat.at[:F, rank * O:(rank + 1) * O].set(
        jnp.transpose(w_linear).astype(compute_dtype))

    rows_q = jnp.arange(rank * O)
    s_quad = jnp.zeros((n_pad, o_pad), jnp.float32).at[rows_q, rows_q % O].set(1.0)
    rows_l = jnp.arange(O)
    s_lin = jnp.zeros((n_pad, o_pad), jnp.float32).at[rank * O + rows_l, rows_l].set(1.0)
    return w_cat, s_quad, s_lin


def quadratic_polynomial_layer(x, w_cat, s_quad, s_lin, *, rank: int,
                               out_features: int, in_features: int,
                               n_pad: int, f_pad: int, o_pad: int,
                               sqrt: bool = False, eps: float = 1e-6,
                               compute_dtype=jnp.bfloat16):
    """x: (batch, in_features); w_cat/s_quad/s_lin from prepare_quadratic_weights."""
    batch = x.shape[0]
    out_dtype = x.dtype
    assert w_cat.shape == (f_pad, n_pad)
    assert s_quad.shape == (n_pad, o_pad) and s_lin.shape == (n_pad, o_pad)

    # ---- batch tiling: t_b <= 512; keep >= 2 tiles when the batch is large
    #      enough so the "parallel" axis can shard across v7x's two TCs ----
    b8 = _round_up(batch, 8)
    if b8 <= 128:
        t_b = b8
    elif b8 <= 1024:
        t_b = _round_up((b8 + 1) // 2, 8)
    else:
        t_b = 512
    b_pad = _round_up(b8, t_b)

    # ---- K tiling: single tile (weight + selection mats resident) when small ----
    if f_pad <= 2048:
        t_k = f_pad
    else:
        t_k = 2048 if f_pad % 2048 == 0 else 1024
    assert f_pad % t_k == 0, "f_pad must be built with _pad_dims()"
    num_k = f_pad // t_k

    # ---- activations: cast + pad only when actually needed ----
    if x.shape == (b_pad, f_pad) and x.dtype == compute_dtype:
        x_p = x
    else:
        x_p = jnp.zeros((b_pad, f_pad), compute_dtype)
        x_p = x_p.at[:batch, :in_features].set(x.astype(compute_dtype))

    # ---- VMEM budget from the real tile footprint, clamped to the hardware cap ----
    cds = jnp.dtype(compute_dtype).itemsize
    ods = jnp.dtype(out_dtype).itemsize
    tile_bytes = (2 * t_b * t_k * cds          # activations (double-buffered)
                  + 2 * t_k * n_pad * cds      # fused packed weight
                  + 2 * 2 * n_pad * o_pad * 4  # two selection matrices (f32)
                  + 2 * t_b * o_pad * ods      # output
                  + t_b * n_pad * 4)           # f32 projection accumulator
    vmem_cap = _vmem_capacity_bytes()
    vmem_limit = int(min(max(32 << 20, 2 * tile_bytes), (vmem_cap * 3) // 4))

    kernel = functools.partial(_quad_poly_kernel, sqrt=sqrt, eps=eps)

    out_p = pl.pallas_call(
        kernel,
        out_shape=jax.ShapeDtypeStruct((b_pad, o_pad), out_dtype),
        grid_spec=pltpu.PrefetchScalarGridSpec(
            num_scalar_prefetch=0,
            grid=(b_pad // t_b, num_k),
            in_specs=[
                # activations: (t_b, t_k) tile at (batch tile b, K tile k)
                pl.BlockSpec((t_b, t_k), lambda b, k: (b, k)),
                # fused packed weight: (t_k, n_pad) tile at K tile k
                # (single K tile => constant index => DMA'd once, stays resident)
                # NOTE: if multi-K weight DMA shows up exposed, bump to
                # pipeline_mode=pl.Buffered(3) here.
                pl.BlockSpec((t_k, n_pad), lambda b, k: (k, 0)),
                # selection matrices: constant index => resident in VMEM
                pl.BlockSpec((n_pad, o_pad), lambda b, k: (0, 0)),
                pl.BlockSpec((n_pad, o_pad), lambda b, k: (0, 0)),
            ],
            # output resident across k; written once at the last K step
            out_specs=pl.BlockSpec((t_b, o_pad), lambda b, k: (b, 0)),
            scratch_shapes=[
                pltpu.VMEM((t_b, n_pad), jnp.float32),   # K-reduction accumulator
            ],
        ),
        compiler_params=pltpu.CompilerParams(
            dimension_semantics=("parallel", "arbitrary"),
            vmem_limit_bytes=vmem_limit,
        ),
    )(x_p, w_cat, s_quad, s_lin)

    return out_p[:batch, :out_features]


def _reference(x, w_linear, w_quadratic, *, rank, out_features, sqrt, eps):
    hp = jax.lax.Precision.HIGHEST
    lin = jnp.dot(x, w_linear.T, precision=hp)
    q = jnp.dot(x, w_quadratic.T, precision=hp) ** 2
    q = q.reshape(x.shape[0], rank, out_features).sum(axis=1)
    if sqrt:
        q = jnp.sqrt(q + eps)
    return q + lin


if __name__ == "__main__":
    in_features, out_features, rank = 32, 16, 4
    batch = 8
    eps = 1e-6

    key = jax.random.PRNGKey(0)
    kx, kl, kq = jax.random.split(key, 3)

    # Deterministic "nn.Linear"-style init: U(-1/sqrt(fan_in), 1/sqrt(fan_in))
    bound = 1.0 / (in_features ** 0.5)
    x = jax.random.normal(kx, (batch, in_features), dtype=jnp.float32)
    w_linear = jax.random.uniform(kl, (out_features, in_features),
                                  minval=-bound, maxval=bound, dtype=jnp.float32)
    w_quadratic = jax.random.uniform(kq, (rank * out_features, in_features),
                                     minval=-bound, maxval=bound, dtype=jnp.float32)

    o_pad, n_pad, f_pad = _pad_dims(in_features, out_features, rank)

    for compute_dtype in (jnp.bfloat16, jnp.float32):
        # One-time weight fusion / packing (keep OUT of the per-call path).
        w_cat, s_quad, s_lin = prepare_quadratic_weights(
            w_linear, w_quadratic, rank=rank, out_features=out_features,
            in_features=in_features, n_pad=n_pad, f_pad=f_pad, o_pad=o_pad,
            compute_dtype=compute_dtype)

        # Reference on operands rounded to the compute dtype: the kernel's MXU
        # products of those exact values accumulate in f32, same as the reference.
        xr = x.astype(compute_dtype).astype(jnp.float32)
        wlr = w_linear.astype(compute_dtype).astype(jnp.float32)
        wqr = w_quadratic.astype(compute_dtype).astype(jnp.float32)

        for sqrt_flag in (False, True):
            out = quadratic_polynomial_layer(
                x, w_cat, s_quad, s_lin, rank=rank, out_features=out_features,
                in_features=in_features, n_pad=n_pad, f_pad=f_pad, o_pad=o_pad,
                sqrt=sqrt_flag, eps=eps, compute_dtype=compute_dtype)
            out = jax.block_until_ready(out)

            ref = _reference(xr, wlr, wqr, rank=rank, out_features=out_features,
                             sqrt=sqrt_flag, eps=eps)
            assert out.shape == (batch, out_features)
            assert jnp.allclose(out, ref, atol=5e-3, rtol=5e-3), (
                f"mismatch vs reference (compute_dtype={jnp.dtype(compute_dtype).name}, "
                f"sqrt={sqrt_flag})")

    print("KERNEL_OK")
</pallas_src>

<mosaic_0001>
module attributes {stable_mosaic.version = 11 : i64} {
  func.func @_quad_poly_kernel(%arg0: i32, %arg1: i32, %arg2: memref<8x128xbf16, #tpu.memory_space<vmem>>, %arg3: memref<128x128xbf16, #tpu.memory_space<vmem>>, %arg4: memref<128x128xf32, #tpu.memory_space<vmem>>, %arg5: memref<128x128xf32, #tpu.memory_space<vmem>>, %arg6: memref<8x128xf32, #tpu.memory_space<vmem>>, %arg7: memref<8x128xf32, #tpu.memory_space<vmem>>) attributes {dimension_semantics = [#tpu.dimension_semantics<parallel>, #tpu.dimension_semantics<arbitrary>], iteration_bounds = array<i64: 1, 1>, scalar_prefetch = 0 : i64, scratch_operands = 1 : i64, tpu.core_type = #tpu.core_type<tc>, window_params = [{transform_indices = @transform_0, window_bounds = array<i64: 8, 128>}, {transform_indices = @transform_1, window_bounds = array<i64: 128, 128>}, {pipeline_mode = #tpu.pipeline_mode<synchronous>, transform_indices = @transform_2, window_bounds = array<i64: 128, 128>}, {pipeline_mode = #tpu.pipeline_mode<synchronous>, transform_indices = @transform_3, window_bounds = array<i64: 128, 128>}, {transform_indices = @transform_4, window_bounds = array<i64: 8, 128>}]} {
    %c0_i32 = arith.constant 0 : i32
    %0 = arith.cmpi eq, %arg1, %c0_i32 : i32
    %1 = arith.extui %0 : i1 to i32
    %c0_i32_0 = arith.constant 0 : i32
    %2 = arith.cmpi ne, %1, %c0_i32_0 : i32
    scf.if %2 {
      %cst_10 = arith.constant 0.000000e+00 : f32
      %12 = vector.broadcast %cst_10 : f32 to vector<8x128xf32>
      %c0_11 = arith.constant 0 : index
      %c0_12 = arith.constant 0 : index
      %13 = vector.load %arg7[%c0_11, %c0_12] : memref<8x128xf32, #tpu.memory_space<vmem>>, vector<8x128xf32>
      tpu.vector_store %arg7[%c0_11, %c0_12], %12 {strides = array<i32>} : memref<8x128xf32, #tpu.memory_space<vmem>>, vector<8x128xf32>,
    } else {
    }
    %c0 = arith.constant 0 : index
    %c0_1 = arith.constant 0 : index
    %3 = vector.load %arg7[%c0, %c0_1] : memref<8x128xf32, #tpu.memory_space<vmem>>, vector<8x128xf32>
    %c0_2 = arith.constant 0 : index
    %c0_3 = arith.constant 0 : index
    %4 = vector.load %arg2[%c0_2, %c0_3] : memref<8x128xbf16, #tpu.memory_space<vmem>>, vector<8x128xbf16>
    %c0_4 = arith.constant 0 : index
    %c0_5 = arith.constant 0 : index
    %5 = vector.load %arg3[%c0_4, %c0_5] : memref<128x128xbf16, #tpu.memory_space<vmem>>, vector<128x128xbf16>
    %cst = arith.constant dense<0.000000e+00> : vector<8x128xf32>
    %6 = tpu.matmul %4, %5, %cst {dimension_numbers = #tpu.dot_dimension_numbers<[1], [0], [0], [1], [0, 0, 1, 1], [], []>} : vector<8x128xbf16>, vector<128x128xbf16>, vector<8x128xf32> -> vector<8x128xf32>
    %7 = arith.addf %3, %6 : vector<8x128xf32>
    %c0_6 = arith.constant 0 : index
    %c0_7 = arith.constant 0 : index
    %8 = vector.load %arg7[%c0_6, %c0_7] : memref<8x128xf32, #tpu.memory_space<vmem>>, vector<8x128xf32>
    tpu.vector_store %arg7[%c0_6, %c0_7], %7 {strides = array<i32>} : memref<8x128xf32, #tpu.memory_space<vmem>>, vector<8x128xf32>,
    %c0_i32_8 = arith.constant 0 : i32
    %9 = arith.cmpi eq, %arg1, %c0_i32_8 : i32
    %10 = arith.extui %9 : i1 to i32
    %c0_i32_9 = arith.constant 0 : i32
    %11 = arith.cmpi ne, %10, %c0_i32_9 : i32
    scf.if %11 {
      %c0_10 = arith.constant 0 : index
      %c0_11 = arith.constant 0 : index
      %12 = vector.load %arg7[%c0_10, %c0_11] : memref<8x128xf32, #tpu.memory_space<vmem>>, vector<8x128xf32>
      %13 = arith.mulf %12, %12 : vector<8x128xf32>
      %c0_12 = arith.constant 0 : index
      %c0_13 = arith.constant 0 : index
      %14 = vector.load %arg4[%c0_12, %c0_13] : memref<128x128xf32, #tpu.memory_space<vmem>>, vector<128x128xf32>
      %cst_14 = arith.constant dense<0.000000e+00> : vector<8x128xf32>
      %15 = tpu.matmul %13, %14, %cst_14 {dimension_numbers = #tpu.dot_dimension_numbers<[1], [0], [0], [1], [0, 0, 1, 1], [], []>} : vector<8x128xf32>, vector<128x128xf32>, vector<8x128xf32> -> vector<8x128xf32>
      %c0_15 = arith.constant 0 : index
      %c0_16 = arith.constant 0 : index
      %16 = vector.load %arg5[%c0_15, %c0_16] : memref<128x128xf32, #tpu.memory_space<vmem>>, vector<128x128xf32>
      %cst_17 = arith.constant dense<0.000000e+00> : vector<8x128xf32>
      %17 = tpu.matmul %12, %16, %cst_17 {dimension_numbers = #tpu.dot_dimension_numbers<[1], [0], [0], [1], [0, 0, 1, 1], [], []>} : vector<8x128xf32>, vector<128x128xf32>, vector<8x128xf32> -> vector<8x128xf32>
      %18 = arith.addf %15, %17 : vector<8x128xf32>
      %c0_18 = arith.constant 0 : index
      %c0_19 = arith.constant 0 : index
      %19 = vector.load %arg6[%c0_18, %c0_19] : memref<8x128xf32, #tpu.memory_space<vmem>>, vector<8x128xf32>
      tpu.vector_store %arg6[%c0_18, %c0_19], %18 {strides = array<i32>} : memref<8x128xf32, #tpu.memory_space<vmem>>, vector<8x128xf32>,
    } else {
    }
    return
  }
  func.func @transform_0(%arg0: i32, %arg1: i32) -> (i32, i32) {
    %c0_i32 = arith.constant 0 : i32
    return %arg0, %arg1 : i32, i32
  }
  func.func @transform_1(%arg0: i32, %arg1: i32) -> (i32, i32) {
    %c0_i32 = arith.constant 0 : i32
    %c0_i32_0 = arith.constant 0 : i32
    return %arg1, %c0_i32 : i32, i32
  }
  func.func @transform_2(%arg0: i32, %arg1: i32) -> (i32, i32) {
    %c0_i32 = arith.constant 0 : i32
    %c0_i32_0 = arith.constant 0 : i32
    %c0_i32_1 = arith.constant 0 : i32
    return %c0_i32, %c0_i32_0 : i32, i32
  }
  func.func @transform_3(%arg0: i32, %arg1: i32) -> (i32, i32) {
    %c0_i32 = arith.constant 0 : i32
    %c0_i32_0 = arith.constant 0 : i32
    %c0_i32_1 = arith.constant 0 : i32
    return %c0_i32, %c0_i32_0 : i32, i32
  }
  func.func @transform_4(%arg0: i32, %arg1: i32) -> (i32, i32) {
    %c0_i32 = arith.constant 0 : i32
    %c0_i32_0 = arith.constant 0 : i32
    return %arg0, %c0_i32 : i32, i32
  }
}

</mosaic_0001>

<bundles_post_ra>
// kernel: tpu_custom_call.1
= control target key start
LH: loop header
LB: loop body
LE: loop exit
PB: predicated region body
PF: predicated region fallthrough
CT: control target
= control target key end

     0   :  { %9 = vsyncpa [#allocation4], 0  ;;  %s745_s0 = inlined_call_operand.hbm [shape: bf16[8,128], index: 0, kind: input, shape index: {}]   ;;  %s746_s1 = inlined_call_operand.hbm [shape: bf16[128,128], index: 1, kind: input, shape index: {}]   ;;  %s747_s2 = inlined_call_operand.hbm [shape: f32[128,128], index: 2, kind: input, shape index: {}]   ;;  %s748_s3 = inlined_call_operand.hbm [shape: f32[128,128], index: 3, kind: input, shape index: {}]   ;;  %s749_s4 = inlined_call_operand.hbm [shape: f32[8,128], index: 4, kind: output, shape index: {}]  }
   0x1   :  { %10 = vsyncpa [#allocation7], 0 }
   0x2   :  { %11 = vsyncpa [#allocation10], 0 }
   0x3   :  { %12 = vsyncpa [#allocation5], 0  ;;  %s648_s15 = smov [#allocation6]  }
   0x4   :  { %s28_s16 = sshll.u32 %s648_s15, 4  ;;  %s29_s16 = int_to_ptr.vmem [resolvable:$true] %s28_s16 }
   0x5   :  { %s548_s17 = scalar_lea.vmem %s29_s16, 1024  ;;  %p553_p1 = scmp.lt.s32.totalorder %s29_s16, %s29_s16 }
   0x6   :  { %p549_p0 = scmp.ne.s32.totalorder %s29_s16, %s548_s17  ;;  %p554_p2 = scmp.lt.s32.totalorder %s548_s17, %s548_s17 }
   0x8   :  { %p555_p3 = por %p554_p2, %p553_p1 }
   0xa   :  { %p556_p4 = pnand %p555_p3, %p549_p0 }
   0xc   :  { %559 = shalt.err (!%p556_p4)
}
   0xd   :  { %s649_s18 = smov 64   ;;  %s650_s19 = smov 4  }
   0xe   :  { %34 = dma.hbm_to_vmem [thread:$0]  %s746_s1, 1024, %s29_s16, [#allocation7], %s649_s18, %s649_s18, %s650_s19  }
   0xf   :  { %s651_s22 = smov [#allocation3]   ;;  %s652_s24 = smov [#allocation8]  }
  0x10   :  { %s19_s23 = sshll.u32 %s651_s22, 4  ;;  %s40_s25 = sshll.u32 %s652_s24, 4  ;;  %s20_s23 = int_to_ptr.vmem [resolvable:$true] %s19_s23  ;;  %s41_s25 = int_to_ptr.vmem [resolvable:$true] %s40_s25 }
  0x11   :  { %s568_s26 = scalar_lea.vmem %s20_s23, 64  ;;  %p573_p6 = scmp.lt.s32.totalorder %s20_s23, %s20_s23 }
  0x12   :  { %p569_p5 = scmp.ne.s32.totalorder %s20_s23, %s568_s26  ;;  %p574_p7 = scmp.lt.s32.totalorder %s568_s26, %s568_s26 }
  0x14   :  { %p575_p8 = por %p574_p7, %p573_p6 }
  0x16   :  { %p576_p9 = pnand %p575_p8, %p569_p5 }
  0x18   :  { %579 = shalt.err (!%p576_p9)
}
  0x19   :  { %22 = dma.hbm_to_vmem [thread:$0]  %s745_s0, 64, %s20_s23, [#allocation4]  }
  0x1a   :  { %s588_s29 = scalar_lea.vmem %s41_s25, 2048  ;;  %p593_p11 = scmp.lt.s32.totalorder %s41_s25, %s41_s25 }
  0x1b   :  { %p589_p10 = scmp.ne.s32.totalorder %s41_s25, %s588_s29  ;;  %p594_p12 = scmp.lt.s32.totalorder %s588_s29, %s588_s29 }
  0x1d   :  { %p595_p13 = por %p594_p12, %p593_p11 }
  0x1f   :  { %p596_p0 = pnand %p595_p13, %p589_p10 }
  0x21   :  { %599 = shalt.err (!%p596_p0)
}
  0x22   :  { %s653_s1 = smov 128   ;;  %s654_s30 = smov 8  }
  0x23   :  { %46 = dma.hbm_to_vmem [thread:$0]  %s747_s2, 2048, %s41_s25, [#allocation7], %s653_s1, %s653_s1, %s654_s30  }
  0x24   :  { %s655_s7 = smov [#allocation9]  }
  0x25   :  { %s52_s8 = sshll.u32 %s655_s7, 4  ;;  %s53_s8 = int_to_ptr.vmem [resolvable:$true] %s52_s8 }
  0x26   :  { %s608_s9 = scalar_lea.vmem %s53_s8, 2048  ;;  %p613_p2 = scmp.lt.s32.totalorder %s53_s8, %s53_s8 }
  0x27   :  { %p609_p1 = scmp.ne.s32.totalorder %s53_s8, %s608_s9  ;;  %p614_p3 = scmp.lt.s32.totalorder %s608_s9, %s608_s9 }
  0x29   :  { %p615_p4 = por %p614_p3, %p613_p2 }
  0x2b   :  { %p616_p5 = pnand %p615_p4, %p609_p1 }
  0x2d   :  { %619 = shalt.err (!%p616_p5)
}
  0x2e   :  { %58 = dma.hbm_to_vmem [thread:$0]  %s748_s3, 2048, %s53_s8, [#allocation10], %s653_s1, %s653_s1, %s654_s30  }
  0x2f   :  { %640 = dma.done.wait [#allocation4], 64  }
  0x30   :  { %641 = vsyncadd [#allocation4], 4294967232 }
  0x31   :  { %642 = dma.done.wait [#allocation7], 3072  }
  0x32   :  { %643 = vsyncadd [#allocation7], 4294964224 }
  0x33   :  { %644 = dma.done.wait [#allocation10], 2048  }
  0x34   :  { %645 = vsyncadd [#allocation10], 4294965248  ;;  %v656_v0 = vmov 0.0   ;;  %vm657_vm0 = vmmov 0   ;;  %v532_v1 = vld [vmem:[#allocation6 + $0x38] sm:$0xff]   ;;  %v533_v2 = vld [vmem:[#allocation6 + $0x30] sm:$0xff]  }
  0x35   :  { %431 = vmatprep.subr.bf16.mxu0 %v656_v0  ;;  %447 = vmatprep.mubr.msk.bf16.mxu0 %vm657_vm0, %v656_v0  ;;  %v534_v3 = vld [vmem:[#allocation6 + $0x28] sm:$0xff]   ;;  %v221_v4 = vld [vmem:[#allocation9 + $0x78] sm:$0xff]  ;;  %v220_v5 = vld [vmem:[#allocation9 + $0x70] sm:$0xff]  ;;  %s658_s2 = smov [#allocation11]  }
  0x36   :  { %451 = vmatprep.subr.mxu1 %v656_v0  ;;  %483 = vmatprep.mubr.msk.f32.mxu1 %vm657_vm0, %v656_v0  ;;  %v535_v6 = vld [vmem:[#allocation6 + $0x20] sm:$0xff]   ;;  %v219_v7 = vld [vmem:[#allocation9 + $0x68] sm:$0xff]  ;;  %v536_v9 = vld [vmem:[#allocation6 + $0x18] sm:$0xff]   ;;  %s369_s3 = sshll.u32 %s658_s2, 4  ;;  %s370_s3 = int_to_ptr.vmem [resolvable:$true] %s369_s3 }
  0x37   :  { %432 = vmatpush3.bf16.msra.mxu0 %v532_v1  ;;  %452 = vmatpush3.msra.mxu1 %v221_v4  ;;  %v218_v8 = vld [vmem:[#allocation9 + $0x60] sm:$0xff]  ;;  %v217_v10 = vld [vmem:[#allocation9 + $0x58] sm:$0xff]  ;;  %v216_v11 = vld [vmem:[#allocation9 + $0x50] sm:$0xff]  ;;  %s620_s11 = scalar_lea.vmem %s370_s3, 128  ;;  %p625_p7 = scmp.lt.s32.totalorder %s370_s3, %s370_s3 }
  0x38   :  { %433 = vmatprep.subr.bf16.mxu0 %v656_v0  ;;  %453 = vmatprep.subr.mxu1 %v656_v0  ;;  %v537_v12 = vld [vmem:[#allocation6 + $0x10] sm:$0xff]   ;;  %v215_v13 = vld [vmem:[#allocation9 + $0x48] sm:$0xff]  ;;  %v214_v14 = vld [vmem:[#allocation9 + $0x40] sm:$0xff]  ;;  %p621_p6 = scmp.ne.s32.totalorder %s370_s3, %s620_s11  ;;  %p626_p8 = scmp.lt.s32.totalorder %s620_s11, %s620_s11 }
  0x39   :  { %454 = vmatpush3.msra.mxu1 %v220_v5  ;;  %v538_v15 = vld [vmem:[#allocation6 + $0x8] sm:$0xff]   ;;  %v213_v16 = vld [vmem:[#allocation9 + $0x38] sm:$0xff]  ;;  %v212_v17 = vld [vmem:[#allocation9 + $0x30] sm:$0xff] }
  0x3a   :  { %455 = vmatprep.subr.mxu1 %v656_v0  ;;  %v539_v18 = vld [vmem:[#allocation6] sm:$0xff]   ;;  %v211_v19 = vld [vmem:[#allocation9 + $0x28] sm:$0xff]  ;;  %v78_v21 = vld [vmem:[#allocation3] sm:$0xf]  ;;  %p627_p9 = por %p626_p8, %p625_p7 }
  0x3b   :  { %434 = vmatpush3.bf16.msra.mxu0 %v533_v2  ;;  %456 = vmatpush3.msra.mxu1 %v219_v7  ;;  %v210_v20 = vld [vmem:[#allocation9 + $0x20] sm:$0xff]  ;;  %v209_v22 = vld [vmem:[#allocation9 + $0x18] sm:$0xff]  ;;  %v208_v24 = vld [vmem:[#allocation9 + $0x10] sm:$0xff] }
  0x3c   :  { %435 = vmatprep.subr.bf16.mxu0 %v656_v0  ;;  %457 = vmatprep.subr.mxu1 %v656_v0  ;;  %v205_v23 = vld [vmem:[#allocation8 + $0x78] sm:$0xff]  ;;  %v204_v25 = vld [vmem:[#allocation8 + $0x70] sm:$0xff]  ;;  %v207_v26 = vld [vmem:[#allocation9 + $0x8] sm:$0xff]  ;;  %p628_p10 = pnand %p627_p9, %p621_p6 }
  0x3d   :  { %458 = vmatpush3.msra.mxu1 %v218_v8  ;;  %v203_v27 = vld [vmem:[#allocation8 + $0x68] sm:$0xff]  ;;  %v202_v28 = vld [vmem:[#allocation8 + $0x60] sm:$0xff]  ;;  %v201_v29 = vld [vmem:[#allocation8 + $0x58] sm:$0xff] }
  0x3e   :  { %459 = vmatprep.subr.mxu1 %v656_v0  ;;  %v200_v30 = vld [vmem:[#allocation8 + $0x50] sm:$0xff]  ;;  %v199_v31 = vld [vmem:[#allocation8 + $0x48] sm:$0xff]  ;;  %v198_v32 = vld [vmem:[#allocation8 + $0x40] sm:$0xff] }
  0x3f   :  { %436 = vmatpush3.bf16.msra.mxu0 %v534_v3  ;;  %460 = vmatpush3.msra.mxu1 %v217_v10  ;;  %v197_v33 = vld [vmem:[#allocation8 + $0x38] sm:$0xff]  ;;  %v196_v34 = vld [vmem:[#allocation8 + $0x30] sm:$0xff]  ;;  %v195_v35 = vld [vmem:[#allocation8 + $0x28] sm:$0xff] }
  0x40   :  { %437 = vmatprep.subr.bf16.mxu0 %v656_v0  ;;  %461 = vmatprep.subr.mxu1 %v656_v0  ;;  %v194_v36 = vld [vmem:[#allocation8 + $0x20] sm:$0xff]  ;;  %v193_v37 = vld [vmem:[#allocation8 + $0x18] sm:$0xff]  ;;  %v192_v38 = vld [vmem:[#allocation8 + $0x10] sm:$0xff] }
  0x41   :  { %462 = vmatpush3.msra.mxu1 %v216_v11  ;;  %v206_v39 = vld [vmem:[#allocation9] sm:$0xff]  ;;  %v191_v40 = vld [vmem:[#allocation8 + $0x8] sm:$0xff] }
  0x42   :  { %463 = vmatprep.subr.mxu1 %v656_v0  ;;  %v190_v41 = vld [vmem:[#allocation8] sm:$0xff] }
  0x43   :  { %438 = vmatpush3.bf16.msra.mxu0 %v535_v6  ;;  %464 = vmatpush3.msra.mxu1 %v215_v13 }
  0x44   :  { %439 = vmatprep.subr.bf16.mxu0 %v656_v0  ;;  %465 = vmatprep.subr.mxu1 %v656_v0 }
  0x45   :  { %466 = vmatpush3.msra.mxu1 %v214_v14 }
  0x46   :  { %467 = vmatprep.subr.mxu1 %v656_v0 }
  0x47   :  { %440 = vmatpush3.bf16.msra.mxu0 %v536_v9  ;;  %468 = vmatpush3.msra.mxu1 %v213_v16 }
  0x48   :  { %441 = vmatprep.subr.bf16.mxu0 %v656_v0  ;;  %469 = vmatprep.subr.mxu1 %v656_v0 }
  0x49   :  { %470 = vmatpush3.msra.mxu1 %v212_v17 }
  0x4a   :  { %471 = vmatprep.subr.mxu1 %v656_v0 }
  0x4b   :  { %442 = vmatpush3.bf16.msra.mxu0 %v537_v12  ;;  %472 = vmatpush3.msra.mxu1 %v211_v19 }
  0x4c   :  { %443 = vmatprep.subr.bf16.mxu0 %v656_v0  ;;  %473 = vmatprep.subr.mxu1 %v656_v0 }
  0x4d   :  { %474 = vmatpush3.msra.mxu1 %v210_v20 }
  0x4e   :  { %475 = vmatprep.subr.mxu1 %v656_v0 }
  0x4f   :  { %444 = vmatpush3.bf16.msra.mxu0 %v538_v15  ;;  %476 = vmatpush3.msra.mxu1 %v209_v22 }
  0x50   :  { %445 = vmatprep.subr.bf16.mxu0 %v656_v0  ;;  %477 = vmatprep.subr.mxu1 %v656_v0 }
  0x51   :  { %478 = vmatpush3.msra.mxu1 %v208_v24 }
  0x52   :  { %479 = vmatprep.subr.mxu1 %v656_v0 }
  0x53   :  { %446 = vmatpush3.bf16.msra.mxu0 %v539_v18  ;;  %480 = vmatpush3.msra.mxu1 %v207_v26 }
  0x54   :  { %486 = vmatprep.subr.mxu0 %v656_v0  ;;  %481 = vmatprep.subr.mxu1 %v656_v0 }
  0x55   :  { %482 = vmatpush3.msra.mxu1 %v206_v39 }
  0x56   :  { %448 = vmatmul.mubr.bf16.vlgmr.msra.gmra.mxu0 %v78_v21 }
  0x57   :  { %487 = vmatpush3.msra.mxu0 %v205_v23  ;;  %518 = vmatprep.mubr.msk.f32.mxu0 %vm657_vm0, %v656_v0 }
  0x58   :  { %488 = vmatprep.subr.mxu0 %v656_v0 }
  0x59   :  { %489 = vmatpush3.msra.mxu0 %v204_v25 }
  0x5a   :  { %490 = vmatprep.subr.mxu0 %v656_v0 }
  0x5b   :  { %491 = vmatpush3.msra.mxu0 %v203_v27 }
  0x5c   :  { %492 = vmatprep.subr.mxu0 %v656_v0 }
  0x5d   :  { %493 = vmatpush3.msra.mxu0 %v202_v28 }
  0x5e   :  { %494 = vmatprep.subr.mxu0 %v656_v0 }
  0x5f   :  { %495 = vmatpush3.msra.mxu0 %v201_v29 }
  0x60   :  { %496 = vmatprep.subr.mxu0 %v656_v0 }
  0x61   :  { %497 = vmatpush3.msra.mxu0 %v200_v30 }
  0x62   :  { %498 = vmatprep.subr.mxu0 %v656_v0 }
  0x63   :  { %499 = vmatpush3.msra.mxu0 %v199_v31 }
  0x64   :  { %500 = vmatprep.subr.mxu0 %v656_v0 }
  0x65   :  { %501 = vmatpush3.msra.mxu0 %v198_v32 }
  0x66   :  { %502 = vmatprep.subr.mxu0 %v656_v0 }
  0x67   :  { %503 = vmatpush3.msra.mxu0 %v197_v33 }
  0x68   :  { %504 = vmatprep.subr.mxu0 %v656_v0 }
  0x69   :  { %505 = vmatpush3.msra.mxu0 %v196_v34 }
  0x6a   :  { %506 = vmatprep.subr.mxu0 %v656_v0 }
  0x6b   :  { %507 = vmatpush3.msra.mxu0 %v195_v35 }
  0x6c   :  { %508 = vmatprep.subr.mxu0 %v656_v0 }
  0x6d   :  { %509 = vmatpush3.msra.mxu0 %v194_v36 }
  0x6e   :  { %510 = vmatprep.subr.mxu0 %v656_v0 }
  0x6f   :  { %511 = vmatpush3.msra.mxu0 %v193_v37 }
  0x70   :  { %512 = vmatprep.subr.mxu0 %v656_v0 }
  0x71   :  { %513 = vmatpush3.msra.mxu0 %v192_v38 }
  0x72   :  { %514 = vmatprep.subr.mxu0 %v656_v0 }
  0x73   :  { %515 = vmatpush3.msra.mxu0 %v191_v40 }
  0x74   :  { %516 = vmatprep.subr.mxu0 %v656_v0 }
  0x75   :  { %517 = vmatpush3.msra.mxu0 %v190_v41 }
 0x116   :  { %v177_v42 = vpop.f32.mrf.mxu0 }
 0x117   :  { %v189_v43 = vmul.f32 %v177_v42, %v177_v42  ;;  %484 = vmatmul.mubr.f32.vlgmr.msra.gmra.mxu1 %v177_v42 }
 0x118   :  { %v449_v44 = vpop.f32.mrf.mxu0 }
 0x119   :  { %519 = vmatmul.mubr.f32.vlgmr.msra.gmra.mxu0 %v189_v43 }
 0x11a   :  { %v180_v45 = vpop.f32.mrf.mxu0 }
 0x11c   :  { %v450_v46 = vpop.f32.mrf.mxu0 }
 0x1d7   :  { %v288_v47 = vpop.f32.mrf.mxu1 }
 0x1d9   :  { %v485_v48 = vpop.f32.mrf.mxu1  ;;  %v358_v49 = vpop.f32.mrf.mxu0 }
 0x1da   :  { %v359_v50 = vadd.f32 %v358_v49, %v288_v47 }
 0x1db   :  { %v520_v51 = vpop.f32.mrf.mxu0 }
 0x1dc   :  { %362 = vst [vmem:[#allocation11] sm:$0xff] %v359_v50 }
 0x1dd   :  { %631 = shalt.err (!%p628_p10)
}
 0x1de   :  { %372 = dma.vmem_to_hbm [thread:$0]  %s370_s3, 128, %s749_s4, [#allocation5]  }
 0x1df   :  { %646 = dma.done.wait [#allocation5], 128  }
 0x1e0   :  { %647 = vsyncadd [#allocation5], 4294967168 }
 0x1e1   :  { %376 = vsyncpa [#allocation4], 1 }
 0x1e2   :  { %377 = vsyncpa [#allocation7], 1 }
 0x1e3   :  { %378 = vsyncpa [#allocation10], 1 }
 0x1e4   :  { %379 = vsyncpa [#allocation5], 1 }

</bundles_post_ra>
